<compile_context>
chip_gen: v7x
topology: tpu7x:2x2x1
jax: 0.10.0
libtpu: 0.0.40
codegen_flags: <defaults>
</compile_context>

<pallas_src>
import jax
import jax.numpy as jnp
import numpy as np
from jax.experimental import pallas as pl
from jax.experimental.pallas import tpu as pltpu

LANE = 128          # lane tile (last dim)
MAX_TILE_R = 2048   # sublane rows per grid step (2048*128*4B = 1 MiB / stream)


def _round_up(x, m):
    return ((x + m - 1) // m) * m


def _bce_ref(logit, truth):
    """Pure-JAX reference / small-input fallback (same math as the module)."""
    z = jnp.reshape(logit, (-1,)).astype(jnp.float32)
    t = jnp.reshape(truth, (-1,)).astype(jnp.float32)
    loss = jnp.maximum(z, 0.0) - z * t + jnp.log(1.0 + jnp.exp(-jnp.abs(z)))
    return jnp.sum(loss) / t.shape[0]


def pseudo_bce_loss2d(logit, truth, *, min_pallas_elems=65536):
    """JAX/Pallas port of PseudoBCELoss2d.forward."""
    n = int(np.prod(truth.shape))        # len(t) in the PyTorch module (static)
    rows = -(-n // LANE) if n > 0 else 0

    # Small / degenerate inputs: launch overhead dominates -> let XLA fuse it.
    if n == 0 or n < min_pallas_elems or rows < 8:
        return _bce_ref(logit, truth)

    # Native-dtype streams; cast happens in-kernel (no extra HBM pass).
    x = jnp.reshape(logit, (-1,))
    t = jnp.reshape(truth, (-1,))
    if t.dtype == jnp.bool_:             # bool refs are awkward; cheap widen
        t = t.astype(jnp.uint8)

    # Rare case: flat length not a multiple of 128 -> minimal pad (<128 elems)
    # so the row-major reshape to (rows, 128) is valid.  The padded tail is
    # masked in-kernel, so the pad value is irrelevant.
    n_lane = rows * LANE
    if n_lane != n:
        x = jnp.pad(x, (0, n_lane - n))
        t = jnp.pad(t, (0, n_lane - n))
    x2 = x.reshape(rows, LANE)
    t2 = t.reshape(rows, LANE)

    tile_r = min(MAX_TILE_R, _round_up(rows, 8))     # multiple of 8
    num_blocks = -(-rows // tile_r)
    # Mask is only needed when the last grid block is ragged (rows % tile_r)
    # or the flat length is not lane-aligned; n/rows/tile_r are static.
    need_mask = (rows % tile_r != 0) or (n != rows * LANE)

    def kernel(x_ref, t_ref, partial_ref):
        z = x_ref[...].astype(jnp.float32)            # (tile_r, LANE)
        tt = t_ref[...].astype(jnp.float32)
        # Stable BCE-with-logits, exactly as in the PyTorch module.
        # (log1p would be marginally more precise; kept as log(1+exp) for
        # guaranteed Mosaic lowering — difference is negligible for a mean.)
        loss = jnp.maximum(z, 0.0) - z * tt + jnp.log(1.0 + jnp.exp(-jnp.abs(z)))
        if need_mask:
            i = pl.program_id(0)
            row = jax.lax.broadcasted_iota(jnp.int32, (tile_r, LANE), 0)
            col = jax.lax.broadcasted_iota(jnp.int32, (tile_r, LANE), 1)
            idx = (i * tile_r + row) * LANE + col     # global flat index (i32)
            loss = jnp.where(idx < n, loss, 0.0)
        # Reduce the tile to an (8, LANE) partial-sum slab with elementwise
        # vreg adds (VPU); the final scalar reduce happens in the wrapper.
        partial_ref[...] = jnp.sum(loss.reshape(tile_r // 8, 8, LANE), axis=0)

    partials = pl.pallas_call(
        kernel,
        out_shape=jax.ShapeDtypeStruct((num_blocks * 8, LANE), jnp.float32),
        grid_spec=pltpu.PrefetchScalarGridSpec(
            num_scalar_prefetch=0,
            grid=(num_blocks,),
            in_specs=[
                pl.BlockSpec((tile_r, LANE), lambda i: (i, 0)),  # logits
                pl.BlockSpec((tile_r, LANE), lambda i: (i, 0)),  # targets
            ],
            out_specs=pl.BlockSpec((8, LANE), lambda i: (i, 0)),  # partial sums
        ),
        compiler_params=pltpu.CompilerParams(
            dimension_semantics=("parallel",),   # no carried state -> megacore OK
            vmem_limit_bytes=32 << 20,
        ),
    )(x2, t2)

    return jnp.sum(partials) / n


if __name__ == "__main__":
    key = jax.random.PRNGKey(0)
    k1, k2 = jax.random.split(key)
    # Binary segmentation style inputs, NCHW: (batch=2, channels=4, 16, 16)
    logit = jax.random.normal(k1, (2, 4, 16, 16), dtype=jnp.float32) * 3.0
    truth = jax.random.bernoulli(k2, 0.5, (2, 4, 16, 16)).astype(jnp.float32)

    # Force the Pallas path (the default heuristic would pick the fused-XLA
    # fallback for an input this small).
    loss = pseudo_bce_loss2d(logit, truth, min_pallas_elems=0)
    loss = jax.block_until_ready(loss)

    ref = jax.block_until_ready(_bce_ref(logit, truth))
    np.testing.assert_allclose(np.asarray(loss), np.asarray(ref),
                               rtol=1e-5, atol=1e-6)
    print("KERNEL_OK")
</pallas_src>

<mosaic_0001>
module attributes {stable_mosaic.version = 11 : i64} {
  func.func @kernel(%arg0: i32, %arg1: memref<16x128xf32, #tpu.memory_space<vmem>>, %arg2: memref<16x128xf32, #tpu.memory_space<vmem>>, %arg3: memref<8x128xf32, #tpu.memory_space<vmem>>) attributes {dimension_semantics = [#tpu.dimension_semantics<parallel>], iteration_bounds = array<i64: 1>, scalar_prefetch = 0 : i64, scratch_operands = 0 : i64, tpu.core_type = #tpu.core_type<tc>, window_params = [{transform_indices = @transform_0, window_bounds = array<i64: 16, 128>}, {transform_indices = @transform_1, window_bounds = array<i64: 16, 128>}, {transform_indices = @transform_2, window_bounds = array<i64: 8, 128>}]} {
    %c0 = arith.constant 0 : index
    %c0_0 = arith.constant 0 : index
    %0 = vector.load %arg1[%c0, %c0_0] : memref<16x128xf32, #tpu.memory_space<vmem>>, vector<16x128xf32>
    %c0_1 = arith.constant 0 : index
    %c0_2 = arith.constant 0 : index
    %1 = vector.load %arg2[%c0_1, %c0_2] : memref<16x128xf32, #tpu.memory_space<vmem>>, vector<16x128xf32>
    %cst = arith.constant 0.000000e+00 : f32
    %2 = vector.broadcast %cst : f32 to vector<16x128xf32>
    %3 = arith.maximumf %0, %2 : vector<16x128xf32>
    %4 = arith.mulf %0, %1 : vector<16x128xf32>
    %5 = arith.subf %3, %4 : vector<16x128xf32>
    %6 = math.absf %0 : vector<16x128xf32>
    %cst_3 = arith.constant 0.000000e+00 : f32
    %7 = vector.broadcast %cst_3 : f32 to vector<16x128xf32>
    %8 = arith.subf %7, %6 : vector<16x128xf32>
    %9 = math.exp %8 : vector<16x128xf32>
    %cst_4 = arith.constant 1.000000e+00 : f32
    %10 = vector.broadcast %cst_4 : f32 to vector<16x128xf32>
    %11 = arith.addf %10, %9 : vector<16x128xf32>
    %12 = math.log %11 : vector<16x128xf32>
    %13 = arith.addf %5, %12 : vector<16x128xf32>
    %14 = vector.shape_cast %13 : vector<16x128xf32> to vector<2x8x128xf32>
    %cst_5 = arith.constant dense<0.000000e+00> : vector<8x128xf32>
    %15 = vector.multi_reduction <add>, %14, %cst_5 [0] : vector<2x8x128xf32> to vector<8x128xf32>
    %c0_6 = arith.constant 0 : index
    %c0_7 = arith.constant 0 : index
    %16 = vector.load %arg3[%c0_6, %c0_7] : memref<8x128xf32, #tpu.memory_space<vmem>>, vector<8x128xf32>
    tpu.vector_store %arg3[%c0_6, %c0_7], %15 {strides = array<i32>} : memref<8x128xf32, #tpu.memory_space<vmem>>, vector<8x128xf32>,
    return
  }
  func.func @transform_0(%arg0: i32) -> (i32, i32) {
    %c0_i32 = arith.constant 0 : i32
    %c0_i32_0 = arith.constant 0 : i32
    return %arg0, %c0_i32 : i32, i32
  }
  func.func @transform_1(%arg0: i32) -> (i32, i32) {
    %c0_i32 = arith.constant 0 : i32
    %c0_i32_0 = arith.constant 0 : i32
    return %arg0, %c0_i32 : i32, i32
  }
  func.func @transform_2(%arg0: i32) -> (i32, i32) {
    %c0_i32 = arith.constant 0 : i32
    %c0_i32_0 = arith.constant 0 : i32
    return %arg0, %c0_i32 : i32, i32
  }
}

</mosaic_0001>

<bundles_post_ra>
// kernel: tpu_custom_call.1
= control target key start
LH: loop header
LB: loop body
LE: loop exit
PB: predicated region body
PF: predicated region fallthrough
CT: control target
= control target key end

     0   :  { %7 = vsyncpa [#allocation3], 0  ;;  %s225_s0 = inlined_call_operand.hbm [shape: f32[16,128], index: 0, kind: input, shape index: {}]   ;;  %s226_s1 = inlined_call_operand.hbm [shape: f32[16,128], index: 1, kind: input, shape index: {}]   ;;  %s227_s2 = inlined_call_operand.hbm [shape: f32[8,128], index: 2, kind: output, shape index: {}]  }
   0x1   :  { %8 = vsyncpa [#allocation6], 0 }
   0x2   :  { %9 = vsyncpa [#allocation4], 0  ;;  %s169_s9 = smov [#allocation2]   ;;  %s97_s13 = scalar_lea.hbm %s225_s0, 256 }
   0x3   :  { %s15_s10 = sshll.u32 %s169_s9, 4  ;;  %p98_p0 = scmp.ne.s32.totalorder %s225_s0, %s97_s13  ;;  %s16_s10 = int_to_ptr.vmem [resolvable:$true] %s15_s10 }
   0x4   :  { %p101_p1 = scmp.lt.u32.totalorder %s97_s13, %s225_s0 }
   0x6   :  { %p103_p2 = pnand %p101_p1, %p98_p0 }
   0x8   :  { %106 = shalt.err (!%p103_p2)
}
   0x9   :  { %s107_s18 = scalar_lea.vmem %s16_s10, 256  ;;  %p112_p4 = scmp.lt.s32.totalorder %s16_s10, %s16_s10 }
   0xa   :  { %p108_p3 = scmp.ne.s32.totalorder %s16_s10, %s107_s18  ;;  %p113_p5 = scmp.lt.s32.totalorder %s107_s18, %s107_s18 }
   0xc   :  { %p114_p6 = por %p113_p5, %p112_p4 }
   0xe   :  { %p115_p7 = pnand %p114_p6, %p108_p3 }
  0x10   :  { %118 = shalt.err (!%p115_p7)
}
  0x11   :  { %s170_s19 = smov 128   ;;  %s171_s20 = smov 8  }
  0x12   :  { %21 = dma.hbm_to_vmem [thread:$0]  %s225_s0, 256, %s16_s10, [#allocation3], %s170_s19, %s170_s19, %s171_s20  }
  0x13   :  { %s172_s23 = smov [#allocation5]   ;;  %s119_s27 = scalar_lea.hbm %s226_s1, 256 }
  0x14   :  { %s27_s24 = sshll.u32 %s172_s23, 4  ;;  %p120_p8 = scmp.ne.s32.totalorder %s226_s1, %s119_s27  ;;  %s28_s24 = int_to_ptr.vmem [resolvable:$true] %s27_s24 }
  0x15   :  { %p123_p9 = scmp.lt.u32.totalorder %s119_s27, %s226_s1 }
  0x17   :  { %p125_p10 = pnand %p123_p9, %p120_p8 }
  0x19   :  { %128 = shalt.err (!%p125_p10)
}
  0x1a   :  { %s129_s4 = scalar_lea.vmem %s28_s24, 256  ;;  %p134_p12 = scmp.lt.s32.totalorder %s28_s24, %s28_s24 }
  0x1b   :  { %p130_p11 = scmp.ne.s32.totalorder %s28_s24, %s129_s4  ;;  %p135_p13 = scmp.lt.s32.totalorder %s129_s4, %s129_s4 }
  0x1d   :  { %p136_p0 = por %p135_p13, %p134_p12 }
  0x1f   :  { %p137_p1 = pnand %p136_p0, %p130_p11 }
  0x21   :  { %140 = shalt.err (!%p137_p1)
}
  0x22   :  { %33 = dma.hbm_to_vmem [thread:$0]  %s226_s1, 256, %s28_s24, [#allocation6], %s170_s19, %s170_s19, %s171_s20  }
  0x23   :  { %163 = dma.done.wait [#allocation3], 256  }
  0x24   :  { %164 = vsyncadd [#allocation3], 4294967040 }
  0x25   :  { %165 = dma.done.wait [#allocation6], 256  }
  0x26   :  { %166 = vsyncadd [#allocation6], 4294967040  ;;  %v40_v0 = vld [vmem:[#allocation2] sm:$0xff]  ;;  %v41_v1 = vld [vmem:[#allocation2 + $0x8] sm:$0xff]  ;;  %s173_s1 = smov [#allocation7]  }
  0x27   :  { %v50_v2 = vand.u32 2147483647, %v40_v0  ;;  %v51_v3 = vand.u32 2147483647, %v41_v1  ;;  %v42_v12 = vld [vmem:[#allocation5] sm:$0xff]  ;;  %v43_v13 = vld [vmem:[#allocation5 + $0x8] sm:$0xff] }
  0x28   :  { %v44_v14 = vmax.f32 %v40_v0, 0.0  ;;  %v46_v15 = vmul.f32 %v42_v12, %v40_v0  ;;  %v45_v16 = vmax.f32 %v41_v1, 0.0  ;;  %v47_v17 = vmul.f32 %v43_v13, %v41_v1  ;;  %s74_s6 = sshll.u32 %s173_s1, 4  ;;  %s75_s6 = int_to_ptr.vmem [resolvable:$true] %s74_s6 }
  0x29   :  { %v52_v4 = vsub.f32 0.0, %v50_v2  ;;  %v53_v5 = vsub.f32 0.0, %v51_v3  ;;  %s141_s7 = scalar_lea.vmem %s75_s6, 128  ;;  %p146_p3 = scmp.lt.s32.totalorder %s75_s6, %s75_s6 }
  0x2a   :  { %v48_v18 = vsub.f32 %v44_v14, %v46_v15  ;;  %v49_v20 = vsub.f32 %v45_v16, %v47_v17  ;;  %p142_p2 = scmp.ne.s32.totalorder %s75_s6, %s141_s7  ;;  %p147_p4 = scmp.lt.s32.totalorder %s141_s7, %s141_s7 }
  0x2b   :  { %v54_v6 = vmul.f32 1.442695, %v52_v4  ;;  %v56_v7 = vmul.f32 1.442695, %v53_v5 }
  0x2c   :  { %p148_p5 = por %p147_p4, %p146_p3 }
  0x2d   :  { %89 = vpow2.f32 %v54_v6 }
  0x2e   :  { %91 = vpow2.f32 %v56_v7  ;;  %p149_p6 = pnand %p148_p5, %p142_p2 }
  0x37   :  { %v90_v8 = vpop.eup %89 }
  0x38   :  { %v92_v9 = vpop.eup %91  ;;  %v58_v10 = vadd.f32 1.0, %v90_v8 }
  0x39   :  { %v59_v11 = vadd.f32 1.0, %v92_v9 }
  0x3a   :  { %93 = vlog2.f32 %v58_v10 }
  0x3b   :  { %95 = vlog2.f32 %v59_v11 }
  0x44   :  { %v94_v19 = vpop.eup %93 }
  0x45   :  { %v96_v21 = vpop.eup %95  ;;  %v61_v22 = vmul.f32 0.6931472, %v94_v19 }
  0x46   :  { %v63_v23 = vmul.f32 0.6931472, %v96_v21 }
  0x47   :  { %v64_v24 = vadd.f32 %v61_v22, %v48_v18 }
  0x48   :  { %v65_v25 = vadd.f32 %v63_v23, %v49_v20 }
  0x4a   :  { %v66_v26 = vadd.f32 %v65_v25, %v64_v24 }
  0x4c   :  { %67 = vst [vmem:[#allocation7] sm:$0xff] %v66_v26 }
  0x4d   :  { %152 = shalt.err (!%p149_p6)
}
  0x4e   :  { %s153_s10 = scalar_lea.hbm %s227_s2, 128 }
  0x4f   :  { %p154_p7 = scmp.ne.s32.totalorder %s227_s2, %s153_s10  ;;  %p157_p8 = scmp.lt.u32.totalorder %s153_s10, %s227_s2 }
  0x51   :  { %p159_p9 = pnand %p157_p8, %p154_p7 }
  0x53   :  { %162 = shalt.err (!%p159_p9)
}
  0x54   :  { %77 = dma.vmem_to_hbm [thread:$0]  %s75_s6, 128, %s227_s2, [#allocation4]  }
  0x55   :  { %167 = dma.done.wait [#allocation4], 128  }
  0x56   :  { %168 = vsyncadd [#allocation4], 4294967168 }
  0x57   :  { %81 = vsyncpa [#allocation3], 1 }
  0x58   :  { %82 = vsyncpa [#allocation6], 1 }
  0x59   :  { %83 = vsyncpa [#allocation4], 1 }

</bundles_post_ra>
